<compile_context>
chip_gen: v7x
topology: tpu7x:2x2x1
jax: 0.10.0
libtpu: 0.0.40
codegen_flags: <defaults>
</compile_context>

<pallas_src>
import jax
import jax.numpy as jnp
from jax.experimental import pallas as pl
from jax.experimental.pallas import tpu as pltpu


LANES = 128           # TPU lane width: last dim of the lane-dense 2D slab
MAX_TILE_ROWS = 2048  # 2048 x 128 x 4B = 1 MiB per f32 tile


def poly2_kernel(coef_ref, x_ref, o_ref):
    # coef_ref: (3,) f32 in SMEM -> [a, b, c]
    a = coef_ref[0]
    b = coef_ref[1]
    c = coef_ref[2]
    # Load at the caller's native dtype (keeps HBM traffic minimal), upcast
    # in-register for the math.  Horner form: (b*x + a)*x + c.
    x = x_ref[...].astype(jnp.float32)
    y = (b * x + a) * x + c
    o_ref[...] = y.astype(o_ref.dtype)


def polynomial2(x, a, b, c):
    """Elementwise y = a*x + b*x**2 + c for any shape/dtype; a, b, c scalars."""
    orig_shape = x.shape
    dtype = x.dtype
    total = x.size

    coefs = jnp.stack([
        jnp.asarray(a).reshape(()),
        jnp.asarray(b).reshape(()),
        jnp.asarray(c).reshape(()),
    ]).astype(jnp.float32)

    # Flatten to a lane-dense 2D slab (rows, 128).
    flat = x.reshape(-1)
    rows = pl.cdiv(total, LANES)

    if rows <= MAX_TILE_ROWS:
        # Small problem: single block == full array, no pipelining overhead.
        tile_rows = rows
        num_tiles = 1
    else:
        # Large problem: big tiles to amortize per-step overhead and hit the
        # HBM roofline; grid shards across TCs via "parallel" semantics.
        tile_rows = MAX_TILE_ROWS
        num_tiles = pl.cdiv(rows, tile_rows)
        rows = num_tiles * tile_rows

    padded = rows * LANES
    if padded != total:
        # Only taken when total isn't a multiple of the slab size; costs one
        # extra HBM copy, unavoidable because the (rows, 128) reshape needs it.
        flat = jnp.pad(flat, (0, padded - total))
    x2d = flat.reshape(rows, LANES)

    # TODO(synk): pass input_output_aliases={1: 0} when the caller donates x,
    # to reuse the input HBM buffer for the output.
    out = pl.pallas_call(
        poly2_kernel,
        out_shape=jax.ShapeDtypeStruct((rows, LANES), dtype),
        grid=(num_tiles,),
        in_specs=[
            # Scalar coefficients live in SMEM; same full (3,) block every step.
            pl.BlockSpec(memory_space=pltpu.MemorySpace.SMEM),
            pl.BlockSpec((tile_rows, LANES), lambda i: (i, 0)),
        ],
        out_specs=pl.BlockSpec((tile_rows, LANES), lambda i: (i, 0)),
        compiler_params=pltpu.CompilerParams(
            # Row-tile axis is embarrassingly parallel -> shardable across
            # v7x's 2 TensorCores when the grid is > 1; harmless for grid=(1,).
            dimension_semantics=("parallel",),
        ),
    )(coefs, x2d)

    out_flat = out.reshape(-1)
    if padded != total:
        out_flat = out_flat[:total]
    return out_flat.reshape(orig_shape)


if __name__ == "__main__":
    key = jax.random.PRNGKey(0)
    kx, ka, kb, kc = jax.random.split(key, 4)

    # Deterministic "parameters" (torch.randn(1) analogues)
    a = jax.random.normal(ka, (1,), dtype=jnp.float32)[0]
    b = jax.random.normal(kb, (1,), dtype=jnp.float32)[0]
    c = jax.random.normal(kc, (1,), dtype=jnp.float32)[0]

    # Small NCHW input
    x = jax.random.normal(kx, (2, 4, 16, 16), dtype=jnp.float32)

    y = jax.block_until_ready(polynomial2(x, a, b, c))

    # Pure-JAX reference check
    y_ref = a * x + b * x**2 + c
    assert y.shape == x.shape and y.dtype == x.dtype
    assert jnp.allclose(y, y_ref, atol=1e-5, rtol=1e-5)

    print("KERNEL_OK")
</pallas_src>

<mosaic_0001>
module attributes {stable_mosaic.version = 11 : i64} {
  func.func @poly2_kernel(%arg0: i32, %arg1: memref<3xf32, #tpu.memory_space<smem>>, %arg2: memref<16x128xf32, #tpu.memory_space<vmem>>, %arg3: memref<16x128xf32, #tpu.memory_space<vmem>>) attributes {dimension_semantics = [#tpu.dimension_semantics<parallel>], iteration_bounds = array<i64: 1>, scalar_prefetch = 0 : i64, scratch_operands = 0 : i64, tpu.core_type = #tpu.core_type<tc>, window_params = [{transform_indices = @transform_0, window_bounds = array<i64: 3>}, {transform_indices = @transform_1, window_bounds = array<i64: 16, 128>}, {transform_indices = @transform_2, window_bounds = array<i64: 16, 128>}]} {
    %c0 = arith.constant 0 : index
    %0 = memref.load %arg1[%c0] : memref<3xf32, #tpu.memory_space<smem>>
    %c1 = arith.constant 1 : index
    %1 = memref.load %arg1[%c1] : memref<3xf32, #tpu.memory_space<smem>>
    %c2 = arith.constant 2 : index
    %2 = memref.load %arg1[%c2] : memref<3xf32, #tpu.memory_space<smem>>
    %c0_0 = arith.constant 0 : index
    %c0_1 = arith.constant 0 : index
    %3 = vector.load %arg2[%c0_0, %c0_1] : memref<16x128xf32, #tpu.memory_space<vmem>>, vector<16x128xf32>
    %4 = vector.broadcast %1 : f32 to vector<16x128xf32>
    %5 = arith.mulf %4, %3 : vector<16x128xf32>
    %6 = vector.broadcast %0 : f32 to vector<16x128xf32>
    %7 = arith.addf %5, %6 : vector<16x128xf32>
    %8 = arith.mulf %7, %3 : vector<16x128xf32>
    %9 = vector.broadcast %2 : f32 to vector<16x128xf32>
    %10 = arith.addf %8, %9 : vector<16x128xf32>
    %c0_2 = arith.constant 0 : index
    %c0_3 = arith.constant 0 : index
    %11 = vector.load %arg3[%c0_2, %c0_3] : memref<16x128xf32, #tpu.memory_space<vmem>>, vector<16x128xf32>
    tpu.vector_store %arg3[%c0_2, %c0_3], %10 {strides = array<i32>} : memref<16x128xf32, #tpu.memory_space<vmem>>, vector<16x128xf32>,
    return
  }
  func.func @transform_0(%arg0: i32) -> i32 {
    %c0_i32 = arith.constant 0 : i32
    %c0_i32_0 = arith.constant 0 : i32
    return %c0_i32 : i32
  }
  func.func @transform_1(%arg0: i32) -> (i32, i32) {
    %c0_i32 = arith.constant 0 : i32
    %c0_i32_0 = arith.constant 0 : i32
    return %arg0, %c0_i32 : i32, i32
  }
  func.func @transform_2(%arg0: i32) -> (i32, i32) {
    %c0_i32 = arith.constant 0 : i32
    %c0_i32_0 = arith.constant 0 : i32
    return %arg0, %c0_i32 : i32, i32
  }
}

</mosaic_0001>

<bundles_post_ra>
// kernel: tpu_custom_call.1
= control target key start
LH: loop header
LB: loop body
LE: loop exit
PB: predicated region body
PF: predicated region fallthrough
CT: control target
= control target key end

     0   :  { %7 = vsyncpa [#allocation5], 0  ;;  %s202_s0 = inlined_call_operand.hbm [shape: f32[3], index: 0, kind: input, shape index: {}]   ;;  %s203_s1 = inlined_call_operand.hbm [shape: f32[16,128], index: 1, kind: input, shape index: {}]   ;;  %s204_s2 = inlined_call_operand.hbm [shape: f32[16,128], index: 2, kind: output, shape index: {}]  }
   0x1   :  { %8 = vsyncpa [#allocation3], 0 }
   0x2   :  { %9 = vsyncpa [#allocation4], 0  ;;  %s80_s11 = scalar_lea.hbm %s202_s0, 16 }
   0x3   :  { %p81_p0 = scmp.ne.s32.totalorder %s202_s0, %s80_s11  ;;  %p84_p1 = scmp.lt.u32.totalorder %s80_s11, %s202_s0 }
   0x5   :  { %p86_p2 = pnand %p84_p1, %p81_p0 }
   0x7   :  { %89 = shalt.err (!%p86_p2)
}
   0x8   :  { %s140_s16 = smov [#allocation2]   ;;  %s141_s19 = smov [#allocation6]  }
   0x9   :  { %17 = dma.hbm_to_smem %s202_s0, 16, %s140_s16, [#allocation5]  }
   0xa   :  { %s23_s20 = sshll.u32 %s141_s19, 4  ;;  %s90_s23 = scalar_lea.hbm %s203_s1, 256  ;;  %s24_s20 = int_to_ptr.vmem [resolvable:$true] %s23_s20 }
   0xb   :  { %p91_p3 = scmp.ne.s32.totalorder %s203_s1, %s90_s23  ;;  %p94_p4 = scmp.lt.u32.totalorder %s90_s23, %s203_s1 }
   0xd   :  { %p96_p5 = pnand %p94_p4, %p91_p3 }
   0xf   :  { %99 = shalt.err (!%p96_p5)
}
  0x10   :  { %s100_s28 = scalar_lea.vmem %s24_s20, 256  ;;  %p105_p7 = scmp.lt.s32.totalorder %s24_s20, %s24_s20 }
  0x11   :  { %p101_p6 = scmp.ne.s32.totalorder %s24_s20, %s100_s28  ;;  %p106_p8 = scmp.lt.s32.totalorder %s100_s28, %s100_s28 }
  0x13   :  { %p107_p9 = por %p106_p8, %p105_p7 }
  0x15   :  { %p108_p10 = pnand %p107_p9, %p101_p6 }
  0x17   :  { %111 = shalt.err (!%p108_p10)
}
  0x18   :  { %s142_s0 = smov 128   ;;  %s143_s29 = smov 8  }
  0x19   :  { %29 = dma.hbm_to_vmem [thread:$0]  %s203_s1, 256, %s24_s20, [#allocation3], %s142_s0, %s142_s0, %s143_s29  }
  0x1a   :  { %134 = dma.done.wait [#allocation5], 16  }
  0x1b   :  { %135 = vsyncadd [#allocation5], 4294967280 }
  0x1c   :  { %136 = dma.done.wait [#allocation3], 256  }
  0x1d   :  { %137 = vsyncadd [#allocation3], 4294967040 }
  0x1e   :  { %36 = sfence }
  0x1f   :  { %s37_s4 = sld [smem:[#allocation2]]  ;;  %s73_s5 = sld [smem:[#allocation2 + $0x1]]  ;;  %v40_v0 = vld [vmem:[#allocation6] sm:$0xff]  ;;  %v41_v1 = vld [vmem:[#allocation6 + $0x8] sm:$0xff] }
  0x20   :  { %s74_s6 = sld [smem:[#allocation2 + $0x2]]  ;;  %s144_s7 = smov [#allocation7]  }
  0x21   :  { %s60_s8 = sshll.u32 %s144_s7, 4  ;;  %s61_s8 = int_to_ptr.vmem [resolvable:$true] %s60_s8 }
  0x22   :  { %s112_s1 = scalar_lea.vmem %s61_s8, 256  ;;  %p117_p12 = scmp.lt.s32.totalorder %s61_s8, %s61_s8 }
  0x23   :  { %p113_p11 = scmp.ne.s32.totalorder %s61_s8, %s112_s1  ;;  %p118_p13 = scmp.lt.s32.totalorder %s112_s1, %s112_s1 }
  0x25   :  { %v42_v2 = vstv %s73_s5  ;;  %v45_v3 = vstv %s37_s4  ;;  %p119_p0 = por %p118_p13, %p117_p12 }
  0x26   :  { %v43_v4 = vmul.f32 %v42_v2, %v40_v0  ;;  %v44_v5 = vmul.f32 %v42_v2, %v41_v1  ;;  %v50_v8 = vstv %s74_s6 }
  0x27   :  { %p120_p1 = pnand %p119_p0, %p113_p11 }
  0x28   :  { %v46_v6 = vadd.f32 %v45_v3, %v43_v4  ;;  %v47_v7 = vadd.f32 %v45_v3, %v44_v5 }
  0x2a   :  { %v48_v9 = vmul.f32 %v46_v6, %v40_v0  ;;  %v49_v10 = vmul.f32 %v47_v7, %v41_v1 }
  0x2c   :  { %v51_v11 = vadd.f32 %v50_v8, %v48_v9  ;;  %v52_v12 = vadd.f32 %v50_v8, %v49_v10 }
  0x2e   :  { %53 = vst [vmem:[#allocation7] sm:$0xff] %v51_v11  ;;  %54 = vst [vmem:[#allocation7 + $0x8] sm:$0xff] %v52_v12 }
  0x2f   :  { %123 = shalt.err (!%p120_p1)
}
  0x30   :  { %s124_s11 = scalar_lea.hbm %s204_s2, 256 }
  0x31   :  { %p125_p2 = scmp.ne.s32.totalorder %s204_s2, %s124_s11  ;;  %p128_p3 = scmp.lt.u32.totalorder %s124_s11, %s204_s2 }
  0x33   :  { %p130_p4 = pnand %p128_p3, %p125_p2 }
  0x35   :  { %133 = shalt.err (!%p130_p4)
}
  0x36   :  { %66 = dma.vmem_to_hbm [thread:$0]  %s61_s8, 256, %s204_s2, [#allocation4], %s142_s0, %s142_s0, %s143_s29  }
  0x37   :  { %138 = dma.done.wait [#allocation4], 256  }
  0x38   :  { %139 = vsyncadd [#allocation4], 4294967040 }
  0x39   :  { %70 = vsyncpa [#allocation3], 1 }
  0x3a   :  { %71 = vsyncpa [#allocation4], 1 }
  0x3b   :  { %72 = vsyncpa [#allocation5], 1 }

</bundles_post_ra>
